<compile_context>
chip_gen: v7x
topology: tpu7x:2x2x1
jax: 0.10.0
libtpu: 0.0.40
codegen_flags: <defaults>
</compile_context>

<pallas_src>
import jax
import jax.numpy as jnp
from jax import lax
from jax.experimental import pallas as pl
from jax.experimental.pallas import tpu as pltpu


# ---------------------------------------------------------------------------
# helpers
# ---------------------------------------------------------------------------
def _round_up(n, m):
    return -(-n // m) * m


def _pick_time_tile(T, t_tile):
    t = max(1, min(t_tile, T))
    while T % t:
        t -= 1
    return t


# ---------------------------------------------------------------------------
# Pallas kernel: one fused bidirectional LSTM layer.
# Grid = (direction, time_chunk).  The backward direction (d == 1) walks time chunks
# in reverse via the index_map and walks steps within a chunk in reverse in-kernel.
#
# Block shapes (B = padded batch, Tt = time tile, Dp = per-part input width):
#   x_ref   : (P, Tt*B, Dp)   bf16   rows are time-major (t, b) flattened
#   wih_ref : (1, P, Dp, 4H)  bf16   this direction's input weights, split into P parts
#   whh_ref : (1, H, 4H)      bf16
#   b_ref   : (1, 1, 4H)      f32    b_ih + b_hh
#   out_ref : (1, Tt*B, H)    bf16   this direction's hidden sequence (natural time order)
# ---------------------------------------------------------------------------
def _bilstm_layer_kernel(x_ref, wih_ref, whh_ref, b_ref, out_ref, h_scr, c_scr, xp_scr):
    d = pl.program_id(0)          # 0 = forward, 1 = backward
    tc = pl.program_id(1)         # time chunk (walked in reverse for d == 1 via index_map)
    P, TB, Dp = x_ref.shape
    B, H = h_scr.shape
    Tt = TB // B

    @pl.when(tc == 0)
    def _():                      # fresh h/c at the start of each direction's sweep
        h_scr[...] = jnp.zeros_like(h_scr)
        c_scr[...] = jnp.zeros_like(c_scr)

    # --- prologue: hoisted input projection for the whole chunk -------------
    # One (Tt*B, Dp) @ (Dp, 4H) MXU matmul per input part instead of Tt tiny matmuls;
    # bias broadcast added once per chunk (not once per step).
    xp = jnp.dot(x_ref[0], wih_ref[0, 0], preferred_element_type=jnp.float32)
    for p in range(1, P):
        xp = xp + jnp.dot(x_ref[p], wih_ref[0, p], preferred_element_type=jnp.float32)
    xp_scr[...] = xp + b_ref[0]                       # (Tt*B, 4H) f32

    w_hh = whh_ref[0]                                 # (H, 4H) bf16, resident in vregs

    # --- recurrence: only h @ W_hh + gate math per step ----------------------
    def step(t, carry):
        h, c = carry
        tt = t + d * (Tt - 1 - 2 * t)                 # fwd: t ; bwd: Tt-1-t
        row = pl.multiple_of(tt * B, B)
        gates = xp_scr[pl.ds(row, B)] + jnp.dot(
            h.astype(w_hh.dtype), w_hh, preferred_element_type=jnp.float32)
        i_g = jax.nn.sigmoid(gates[:, 0 * H:1 * H])   # PyTorch gate order [i, f, g, o]
        f_g = jax.nn.sigmoid(gates[:, 1 * H:2 * H])
        g_g = jnp.tanh(gates[:, 2 * H:3 * H])
        o_g = jax.nn.sigmoid(gates[:, 3 * H:4 * H])
        c = f_g * c + i_g * g_g
        h = o_g * jnp.tanh(c)
        out_ref[0, pl.ds(row, B), :] = h.astype(out_ref.dtype)
        return (h, c)

    h, c = lax.fori_loop(0, Tt, step, (h_scr[...], c_scr[...]), unroll=True)
    h_scr[...] = h                                    # carry state to the next time chunk
    c_scr[...] = c


def bilstm_layer(x, w_ih, w_hh, b, *, batch, t_tile=8):
    """Fused bidirectional LSTM layer.

    x:    (P, T*B, Dp)   bf16  time-major rows, B = `batch` (already padded to mult of 8)
    w_ih: (2, P, Dp, 4H) bf16  [direction, input-part, Dp, 4H]
    w_hh: (2, H, 4H)     bf16
    b:    (2, 1, 4H)     f32
    returns (2, T*B, H)  bf16  [fwd hidden sequence, bwd hidden sequence] in natural time order
    """
    P, TB, Dp = x.shape
    B = batch
    T = TB // B
    H = w_hh.shape[1]
    Tt = _pick_time_tile(T, t_tile)
    nT = T // Tt

    def rev(d, tc):   # fwd walks chunks 0..nT-1, bwd walks nT-1..0
        return d * (nT - 1) + (1 - 2 * d) * tc

    return pl.pallas_call(
        _bilstm_layer_kernel,
        out_shape=jax.ShapeDtypeStruct((2, TB, H), jnp.bfloat16),
        grid_spec=pltpu.PrefetchScalarGridSpec(
            num_scalar_prefetch=0,
            grid=(2, nT),
            in_specs=[
                pl.BlockSpec((P, Tt * B, Dp), lambda d, tc: (0, rev(d, tc), 0)),
                pl.BlockSpec((1, P, Dp, 4 * H), lambda d, tc: (d, 0, 0, 0)),
                pl.BlockSpec((1, H, 4 * H), lambda d, tc: (d, 0, 0)),
                pl.BlockSpec((1, 1, 4 * H), lambda d, tc: (d, 0, 0)),
            ],
            out_specs=pl.BlockSpec((1, Tt * B, H), lambda d, tc: (d, rev(d, tc), 0)),
            scratch_shapes=[
                pltpu.VMEM((B, H), jnp.float32),            # h carry
                pltpu.VMEM((B, H), jnp.float32),            # c carry
                pltpu.VMEM((Tt * B, 4 * H), jnp.float32),   # hoisted per-chunk input projection
            ],
        ),
        compiler_params=pltpu.CompilerParams(
            # direction axis -> both TensorCores on v7x; time axis is the sequential carry.
            dimension_semantics=("parallel", "arbitrary"),
            # TODO(synk): re-derive t_tile (and this limit) for production T/B/H;
            # v7x has only 64 MiB physical VMEM.
            vmem_limit_bytes=32 * 1024 * 1024,
        ),
    )(x, w_ih, w_hh, b)


# ---------------------------------------------------------------------------
# Parameter init (mimics PyTorch defaults) and forward pass
# ---------------------------------------------------------------------------
def init_params(key, vocab_size, emb_size, hidden, num_layers, out_dim=1):
    keys = jax.random.split(key, 2 + num_layers)
    params = {}
    # nn.Embedding default: N(0, 1)
    params["embedding"] = jax.random.normal(keys[0], (vocab_size, emb_size), jnp.float32)

    k = 1.0 / float(hidden) ** 0.5
    lstm_layers = []
    for l in range(num_layers):
        d_in = emb_size if l == 0 else 2 * hidden
        P = 1 if l == 0 else 2          # layer 0: one input part; deeper: [fwd-feat, bwd-feat]
        lk = jax.random.split(keys[1 + l], 8)

        def u(kk, shape):
            return jax.random.uniform(kk, shape, jnp.float32, -k, k)

        w_ih_d, w_hh_d, b_d = [], [], []
        for base in (0, 4):             # forward, backward direction
            w_ih = u(lk[base + 0], (d_in, 4 * hidden))      # pre-transposed (D_in, 4H)
            w_hh = u(lk[base + 1], (hidden, 4 * hidden))    # pre-transposed (H, 4H)
            b_ih = u(lk[base + 2], (4 * hidden,))
            b_hh = u(lk[base + 3], (4 * hidden,))
            # split W_ih rows into parts so deeper layers consume the previous layer's
            # (2, T*B, H) output directly (no HBM concat of fwd/bwd halves).
            w_ih_d.append(w_ih.reshape(P, d_in // P, 4 * hidden))
            w_hh_d.append(w_hh)
            b_d.append((b_ih + b_hh).reshape(1, 4 * hidden))
        lstm_layers.append({
            "w_ih": jnp.stack(w_ih_d).astype(jnp.bfloat16),   # (2, P, Dp, 4H)
            "w_hh": jnp.stack(w_hh_d).astype(jnp.bfloat16),   # (2, H, 4H)
            "b": jnp.stack(b_d),                              # (2, 1, 4H) f32
        })
    params["lstm"] = lstm_layers

    # nn.Linear(2H, out_dim): U(-1/sqrt(fan_in), 1/sqrt(fan_in))
    kl = 1.0 / (2.0 * hidden) ** 0.5
    wk, bk = jax.random.split(keys[-1])
    params["w_out"] = jax.random.uniform(wk, (2 * hidden, out_dim), jnp.float32, -kl, kl)
    params["b_out"] = jax.random.uniform(bk, (1, out_dim), jnp.float32, -kl, kl)
    return params


def lstm_model_forward(params, inp, *, t_tile=8):
    """inp: (B, T) int32 token ids -> (B,) float32 (matches PyTorch forward)."""
    B, T = inp.shape
    # Embedding lookup: plain-JAX gather glue (tiny, not a Pallas hot path).
    emb = jnp.take(params["embedding"], inp, axis=0)          # (B, T, E) f32
    Bp = max(8, _round_up(B, 8))                              # pad batch: MXU/sublane friendly
    if Bp != B:
        emb = jnp.pad(emb, ((0, Bp - B), (0, 0), (0, 0)))
    x = jnp.transpose(emb, (1, 0, 2))                         # (T, Bp, E) time-major
    x = x.reshape(1, T * Bp, -1).astype(jnp.bfloat16)         # (P=1, T*Bp, E)

    # TODO(synk): inter-layer dropout omitted (inference-mode semantics; inactive in eval).
    for layer in params["lstm"]:
        x = bilstm_layer(x, layer["w_ih"], layer["w_hh"], layer["b"],
                         batch=Bp, t_tile=t_tile)             # (2, T*Bp, H)

    # PyTorch: vec[:, -1, :H] (fwd dir, last timestep) and vec[:, 0, H:] (bwd dir, first timestep)
    nor_out = x[0, (T - 1) * Bp: T * Bp][:B]                  # (B, H)
    rev_out = x[1, :B]                                        # (B, H)
    vec = jnp.concatenate([nor_out, rev_out], axis=-1).astype(jnp.float32)   # (B, 2H)
    # Final (B,2H)@(2H,1) projection left in plain JAX per perf review: a dedicated
    # pallas_call would be launch/DMA overhead dominated for an O=1 output.
    out = vec @ params["w_out"] + params["b_out"]             # (B, 1)
    return jnp.squeeze(out, axis=-1)                          # (B,)


if __name__ == "__main__":
    VOCAB, EMB, HIDDEN, NUM_LAYERS = 50, 32, 32, 2
    B, T = 2, 8

    key = jax.random.PRNGKey(0)
    pkey, ikey = jax.random.split(key)
    params = init_params(pkey, VOCAB, EMB, HIDDEN, NUM_LAYERS, out_dim=1)

    inp = jax.random.randint(ikey, (B, T), 0, VOCAB, dtype=jnp.int32)

    # t_tile=4 -> two time chunks per direction, exercising the pipelined h/c carry path.
    out = lstm_model_forward(params, inp, t_tile=4)
    jax.block_until_ready(out)
    assert out.shape == (B,), out.shape
    print("KERNEL_OK")
</pallas_src>

<mosaic_0001>
module attributes {stable_mosaic.version = 11 : i64} {
  func.func @_bilstm_layer_kernel(%arg0: i32, %arg1: i32, %arg2: memref<1x32x32xbf16, #tpu.memory_space<vmem>>, %arg3: memref<1x1x32x128xbf16, #tpu.memory_space<vmem>>, %arg4: memref<1x32x128xbf16, #tpu.memory_space<vmem>>, %arg5: memref<1x1x128xf32, #tpu.memory_space<vmem>>, %arg6: memref<1x32x32xbf16, #tpu.memory_space<vmem>>, %arg7: memref<8x32xf32, #tpu.memory_space<vmem>>, %arg8: memref<8x32xf32, #tpu.memory_space<vmem>>, %arg9: memref<32x128xf32, #tpu.memory_space<vmem>>) attributes {dimension_semantics = [#tpu.dimension_semantics<parallel>, #tpu.dimension_semantics<arbitrary>], iteration_bounds = array<i64: 2, 2>, scalar_prefetch = 0 : i64, scratch_operands = 3 : i64, tpu.core_type = #tpu.core_type<tc>, window_params = [{transform_indices = @transform_0, window_bounds = array<i64: 1, 32, 32>}, {transform_indices = @transform_1, window_bounds = array<i64: 1, 1, 32, 128>}, {transform_indices = @transform_2, window_bounds = array<i64: 1, 32, 128>}, {transform_indices = @transform_3, window_bounds = array<i64: 1, 1, 128>}, {transform_indices = @transform_4, window_bounds = array<i64: 1, 32, 32>}]} {
    %c0_i32 = arith.constant 0 : i32
    %0 = arith.cmpi eq, %arg1, %c0_i32 : i32
    %1 = arith.extui %0 : i1 to i32
    %c0_i32_0 = arith.constant 0 : i32
    %2 = arith.cmpi ne, %1, %c0_i32_0 : i32
    scf.if %2 {
      %cst_63 = arith.constant 0.000000e+00 : f32
      %183 = vector.broadcast %cst_63 : f32 to vector<8x32xf32>
      %c0_64 = arith.constant 0 : index
      %c0_65 = arith.constant 0 : index
      %184 = vector.load %arg7[%c0_64, %c0_65] : memref<8x32xf32, #tpu.memory_space<vmem>>, vector<8x32xf32>
      tpu.vector_store %arg7[%c0_64, %c0_65], %183 {strides = array<i32>} : memref<8x32xf32, #tpu.memory_space<vmem>>, vector<8x32xf32>,
      %cst_66 = arith.constant 0.000000e+00 : f32
      %185 = vector.broadcast %cst_66 : f32 to vector<8x32xf32>
      %c0_67 = arith.constant 0 : index
      %c0_68 = arith.constant 0 : index
      %186 = vector.load %arg8[%c0_67, %c0_68] : memref<8x32xf32, #tpu.memory_space<vmem>>, vector<8x32xf32>
      tpu.vector_store %arg8[%c0_67, %c0_68], %185 {strides = array<i32>} : memref<8x32xf32, #tpu.memory_space<vmem>>, vector<8x32xf32>,
    } else {
    }
    %c0 = arith.constant 0 : index
    %c0_1 = arith.constant 0 : index
    %c0_2 = arith.constant 0 : index
    %3 = vector.load %arg2[%c0, %c0_1, %c0_2] : memref<1x32x32xbf16, #tpu.memory_space<vmem>>, vector<1x32x32xbf16>
    %4 = vector.shape_cast %3 : vector<1x32x32xbf16> to vector<32x32xbf16>
    %c0_3 = arith.constant 0 : index
    %c0_4 = arith.constant 0 : index
    %c0_5 = arith.constant 0 : index
    %c0_6 = arith.constant 0 : index
    %5 = vector.load %arg3[%c0_3, %c0_4, %c0_5, %c0_6] : memref<1x1x32x128xbf16, #tpu.memory_space<vmem>>, vector<1x1x32x128xbf16>
    %6 = vector.shape_cast %5 : vector<1x1x32x128xbf16> to vector<32x128xbf16>
    %cst = arith.constant dense<0.000000e+00> : vector<32x128xf32>
    %7 = tpu.matmul %4, %6, %cst {dimension_numbers = #tpu.dot_dimension_numbers<[1], [0], [0], [1], [0, 0, 1, 1], [], []>} : vector<32x32xbf16>, vector<32x128xbf16>, vector<32x128xf32> -> vector<32x128xf32>
    %c0_7 = arith.constant 0 : index
    %c0_8 = arith.constant 0 : index
    %c0_9 = arith.constant 0 : index
    %8 = vector.load %arg5[%c0_7, %c0_8, %c0_9] : memref<1x1x128xf32, #tpu.memory_space<vmem>>, vector<1x1x128xf32>
    %9 = vector.shape_cast %8 : vector<1x1x128xf32> to vector<1x128xf32>
    %10 = vector.broadcast %9 : vector<1x128xf32> to vector<32x128xf32>
    %11 = arith.addf %7, %10 : vector<32x128xf32>
    %c0_10 = arith.constant 0 : index
    %c0_11 = arith.constant 0 : index
    %12 = vector.load %arg9[%c0_10, %c0_11] : memref<32x128xf32, #tpu.memory_space<vmem>>, vector<32x128xf32>
    tpu.vector_store %arg9[%c0_10, %c0_11], %11 {strides = array<i32>} : memref<32x128xf32, #tpu.memory_space<vmem>>, vector<32x128xf32>,
    %c0_12 = arith.constant 0 : index
    %c0_13 = arith.constant 0 : index
    %c0_14 = arith.constant 0 : index
    %13 = vector.load %arg4[%c0_12, %c0_13, %c0_14] : memref<1x32x128xbf16, #tpu.memory_space<vmem>>, vector<1x32x128xbf16>
    %14 = vector.shape_cast %13 : vector<1x32x128xbf16> to vector<32x128xbf16>
    %c0_15 = arith.constant 0 : index
    %c0_16 = arith.constant 0 : index
    %15 = vector.load %arg7[%c0_15, %c0_16] : memref<8x32xf32, #tpu.memory_space<vmem>>, vector<8x32xf32>
    %c0_17 = arith.constant 0 : index
    %c0_18 = arith.constant 0 : index
    %16 = vector.load %arg8[%c0_17, %c0_18] : memref<8x32xf32, #tpu.memory_space<vmem>>, vector<8x32xf32>
    %c0_i32_19 = arith.constant 0 : i32
    %c2_i32 = arith.constant 2 : i32
    %17 = arith.muli %c2_i32, %c0_i32_19 : i32
    %c3_i32 = arith.constant 3 : i32
    %18 = arith.subi %c3_i32, %17 : i32
    %19 = arith.muli %arg0, %18 : i32
    %20 = arith.addi %c0_i32_19, %19 : i32
    %c8_i32 = arith.constant 8 : i32
    %21 = arith.muli %20, %c8_i32 : i32
    %22 = tpu.assume_multiple %21, 8 : i32
    %23 = arith.index_cast %22 : i32 to index
    %c0_20 = arith.constant 0 : index
    %24 = vector.load %arg9[%23, %c0_20] : memref<32x128xf32, #tpu.memory_space<vmem>>, vector<8x128xf32>
    %25 = arith.truncf %15 : vector<8x32xf32> to vector<8x32xbf16>
    %cst_21 = arith.constant dense<0.000000e+00> : vector<8x128xf32>
    %26 = tpu.matmul %25, %14, %cst_21 {dimension_numbers = #tpu.dot_dimension_numbers<[1], [0], [0], [1], [0, 0, 1, 1], [], []>} : vector<8x32xbf16>, vector<32x128xbf16>, vector<8x128xf32> -> vector<8x128xf32>
    %27 = arith.addf %24, %26 : vector<8x128xf32>
    %28 = vector.extract_strided_slice %27 {offsets = [0, 0], sizes = [8, 32], strides = [1, 1]} : vector<8x128xf32> to vector<8x32xf32>
    %29 = arith.negf %28 : vector<8x32xf32>
    %30 = math.exp %29 : vector<8x32xf32>
    %cst_22 = arith.constant 1.000000e+00 : f32
    %31 = vector.broadcast %cst_22 : f32 to vector<8x32xf32>
    %32 = arith.addf %31, %30 : vector<8x32xf32>
    %33 = arith.divf %31, %32 : vector<8x32xf32>
    %34 = vector.extract_strided_slice %27 {offsets = [0, 32], sizes = [8, 32], strides = [1, 1]} : vector<8x128xf32> to vector<8x32xf32>
    %35 = arith.negf %34 : vector<8x32xf32>
    %36 = math.exp %35 : vector<8x32xf32>
    %cst_23 = arith.constant 1.000000e+00 : f32
    %37 = vector.broadcast %cst_23 : f32 to vector<8x32xf32>
    %38 = arith.addf %37, %36 : vector<8x32xf32>
    %39 = arith.divf %37, %38 : vector<8x32xf32>
    %40 = vector.extract_strided_slice %27 {offsets = [0, 64], sizes = [8, 32], strides = [1, 1]} : vector<8x128xf32> to vector<8x32xf32>
    %41 = math.tanh %40 : vector<8x32xf32>
    %42 = vector.extract_strided_slice %27 {offsets = [0, 96], sizes = [8, 32], strides = [1, 1]} : vector<8x128xf32> to vector<8x32xf32>
    %43 = arith.negf %42 : vector<8x32xf32>
    %44 = math.exp %43 : vector<8x32xf32>
    %cst_24 = arith.constant 1.000000e+00 : f32
    %45 = vector.broadcast %cst_24 : f32 to vector<8x32xf32>
    %46 = arith.addf %45, %44 : vector<8x32xf32>
    %47 = arith.divf %45, %46 : vector<8x32xf32>
    %48 = arith.mulf %39, %16 : vector<8x32xf32>
    %49 = arith.mulf %33, %41 : vector<8x32xf32>
    %50 = arith.addf %48, %49 : vector<8x32xf32>
    %51 = math.tanh %50 : vector<8x32xf32>
    %52 = arith.mulf %47, %51 : vector<8x32xf32>
    %53 = arith.truncf %52 : vector<8x32xf32> to vector<8x32xbf16>
    %c0_25 = arith.constant 0 : index
    %54 = arith.index_cast %22 : i32 to index
    %c0_26 = arith.constant 0 : index
    %55 = vector.load %arg6[%c0_25, %54, %c0_26] : memref<1x32x32xbf16, #tpu.memory_space<vmem>>, vector<1x8x32xbf16>
    %56 = vector.shape_cast %55 : vector<1x8x32xbf16> to vector<8x32xbf16>
    %57 = vector.shape_cast %53 : vector<8x32xbf16> to vector<1x8x32xbf16>
    tpu.vector_store %arg6[%c0_25, %54, %c0_26], %57 {strides = array<i32>} : memref<1x32x32xbf16, #tpu.memory_space<vmem>>, vector<1x8x32xbf16>,
    %c1_i32 = arith.constant 1 : i32
    %c2_i32_27 = arith.constant 2 : i32
    %58 = arith.muli %c2_i32_27, %c1_i32 : i32
    %c3_i32_28 = arith.constant 3 : i32
    %59 = arith.subi %c3_i32_28, %58 : i32
    %60 = arith.muli %arg0, %59 : i32
    %61 = arith.addi %c1_i32, %60 : i32
    %c8_i32_29 = arith.constant 8 : i32
    %62 = arith.muli %61, %c8_i32_29 : i32
    %63 = tpu.assume_multiple %62, 8 : i32
    %64 = arith.index_cast %63 : i32 to index
    %c0_30 = arith.constant 0 : index
    %65 = vector.load %arg9[%64, %c0_30] : memref<32x128xf32, #tpu.memory_space<vmem>>, vector<8x128xf32>
    %66 = arith.truncf %52 : vector<8x32xf32> to vector<8x32xbf16>
    %cst_31 = arith.constant dense<0.000000e+00> : vector<8x128xf32>
    %67 = tpu.matmul %66, %14, %cst_31 {dimension_numbers = #tpu.dot_dimension_numbers<[1], [0], [0], [1], [0, 0, 1, 1], [], []>} : vector<8x32xbf16>, vector<32x128xbf16>, vector<8x128xf32> -> vector<8x128xf32>
    %68 = arith.addf %65, %67 : vector<8x128xf32>
    %69 = vector.extract_strided_slice %68 {offsets = [0, 0], sizes = [8, 32], strides = [1, 1]} : vector<8x128xf32> to vector<8x32xf32>
    %70 = arith.negf %69 : vector<8x32xf32>
    %71 = math.exp %70 : vector<8x32xf32>
    %cst_32 = arith.constant 1.000000e+00 : f32
    %72 = vector.broadcast %cst_32 : f32 to vector<8x32xf32>
    %73 = arith.addf %72, %71 : vector<8x32xf32>
    %74 = arith.divf %72, %73 : vector<8x32xf32>
    %75 = vector.extract_strided_slice %68 {offsets = [0, 32], sizes = [8, 32], strides = [1, 1]} : vector<8x128xf32> to vector<8x32xf32>
    %76 = arith.negf %75 : vector<8x32xf32>
    %77 = math.exp %76 : vector<8x32xf32>
    %cst_33 = arith.constant 1.000000e+00 : f32
    %78 = vector.broadcast %cst_33 : f32 to vector<8x32xf32>
    %79 = arith.addf %78, %77 : vector<8x32xf32>
    %80 = arith.divf %78, %79 : vector<8x32xf32>
    %81 = vector.extract_strided_slice %68 {offsets = [0, 64], sizes = [8, 32], strides = [1, 1]} : vector<8x128xf32> to vector<8x32xf32>
    %82 = math.tanh %81 : vector<8x32xf32>
    %83 = vector.extract_strided_slice %68 {offsets = [0, 96], sizes = [8, 32], strides = [1, 1]} : vector<8x128xf32> to vector<8x32xf32>
    %84 = arith.negf %83 : vector<8x32xf32>
    %85 = math.exp %84 : vector<8x32xf32>
    %cst_34 = arith.constant 1.000000e+00 : f32
    %86 = vector.broadcast %cst_34 : f32 to vector<8x32xf32>
    %87 = arith.addf %86, %85 : vector<8x32xf32>
    %88 = arith.divf %86, %87 : vector<8x32xf32>
    %89 = arith.mulf %80, %50 : vector<8x32xf32>
    %90 = arith.mulf %74, %82 : vector<8x32xf32>
    %91 = arith.addf %89, %90 : vector<8x32xf32>
    %92 = math.tanh %91 : vector<8x32xf32>
    %93 = arith.mulf %88, %92 : vector<8x32xf32>
    %94 = arith.truncf %93 : vector<8x32xf32> to vector<8x32xbf16>
    %c0_35 = arith.constant 0 : index
    %95 = arith.index_cast %63 : i32 to index
    %c0_36 = arith.constant 0 : index
    %96 = vector.load %arg6[%c0_35, %95, %c0_36] : memref<1x32x32xbf16, #tpu.memory_space<vmem>>, vector<1x8x32xbf16>
    %97 = vector.shape_cast %96 : vector<1x8x32xbf16> to vector<8x32xbf16>
    %98 = vector.shape_cast %94 : vector<8x32xbf16> to vector<1x8x32xbf16>
    tpu.vector_store %arg6[%c0_35, %95, %c0_36], %98 {strides = array<i32>} : memref<1x32x32xbf16, #tpu.memory_space<vmem>>, vector<1x8x32xbf16>,
    %c2_i32_37 = arith.constant 2 : i32
    %c2_i32_38 = arith.constant 2 : i32
    %99 = arith.muli %c2_i32_38, %c2_i32_37 : i32
    %c3_i32_39 = arith.constant 3 : i32
    %100 = arith.subi %c3_i32_39, %99 : i32
    %101 = arith.muli %arg0, %100 : i32
    %102 = arith.addi %c2_i32_37, %101 : i32
    %c8_i32_40 = arith.constant 8 : i32
    %103 = arith.muli %102, %c8_i32_40 : i32
    %104 = tpu.assume_multiple %103, 8 : i32
    %105 = arith.index_cast %104 : i32 to index
    %c0_41 = arith.constant 0 : index
    %106 = vector.load %arg9[%105, %c0_41] : memref<32x128xf32, #tpu.memory_space<vmem>>, vector<8x128xf32>
    %107 = arith.truncf %93 : vector<8x32xf32> to vector<8x32xbf16>
    %cst_42 = arith.constant dense<0.000000e+00> : vector<8x128xf32>
    %108 = tpu.matmul %107, %14, %cst_42 {dimension_numbers = #tpu.dot_dimension_numbers<[1], [0], [0], [1], [0, 0, 1, 1], [], []>} : vector<8x32xbf16>, vector<32x128xbf16>, vector<8x128xf32> -> vector<8x128xf32>
    %109 = arith.addf %106, %108 : vector<8x128xf32>
    %110 = vector.extract_strided_slice %109 {offsets = [0, 0], sizes = [8, 32], strides = [1, 1]} : vector<8x128xf32> to vector<8x32xf32>
    %111 = arith.negf %110 : vector<8x32xf32>
    %112 = math.exp %111 : vector<8x32xf32>
    %cst_43 = arith.constant 1.000000e+00 : f32
    %113 = vector.broadcast %cst_43 : f32 to vector<8x32xf32>
    %114 = arith.addf %113, %112 : vector<8x32xf32>
    %115 = arith.divf %113, %114 : vector<8x32xf32>
    %116 = vector.extract_strided_slice %109 {offsets = [0, 32], sizes = [8, 32], strides = [1, 1]} : vector<8x128xf32> to vector<8x32xf32>
    %117 = arith.negf %116 : vector<8x32xf32>
    %118 = math.exp %117 : vector<8x32xf32>
    %cst_44 = arith.constant 1.000000e+00 : f32
    %119 = vector.broadcast %cst_44 : f32 to vector<8x32xf32>
    %120 = arith.addf %119, %118 : vector<8x32xf32>
    %121 = arith.divf %119, %120 : vector<8x32xf32>
    %122 = vector.extract_strided_slice %109 {offsets = [0, 64], sizes = [8, 32], strides = [1, 1]} : vector<8x128xf32> to vector<8x32xf32>
    %123 = math.tanh %122 : vector<8x32xf32>
    %124 = vector.extract_strided_slice %109 {offsets = [0, 96], sizes = [8, 32], strides = [1, 1]} : vector<8x128xf32> to vector<8x32xf32>
    %125 = arith.negf %124 : vector<8x32xf32>
    %126 = math.exp %125 : vector<8x32xf32>
    %cst_45 = arith.constant 1.000000e+00 : f32
    %127 = vector.broadcast %cst_45 : f32 to vector<8x32xf32>
    %128 = arith.addf %127, %126 : vector<8x32xf32>
    %129 = arith.divf %127, %128 : vector<8x32xf32>
    %130 = arith.mulf %121, %91 : vector<8x32xf32>
    %131 = arith.mulf %115, %123 : vector<8x32xf32>
    %132 = arith.addf %130, %131 : vector<8x32xf32>
    %133 = math.tanh %132 : vector<8x32xf32>
    %134 = arith.mulf %129, %133 : vector<8x32xf32>
    %135 = arith.truncf %134 : vector<8x32xf32> to vector<8x32xbf16>
    %c0_46 = arith.constant 0 : index
    %136 = arith.index_cast %104 : i32 to index
    %c0_47 = arith.constant 0 : index
    %137 = vector.load %arg6[%c0_46, %136, %c0_47] : memref<1x32x32xbf16, #tpu.memory_space<vmem>>, vector<1x8x32xbf16>
    %138 = vector.shape_cast %137 : vector<1x8x32xbf16> to vector<8x32xbf16>
    %139 = vector.shape_cast %135 : vector<8x32xbf16> to vector<1x8x32xbf16>
    tpu.vector_store %arg6[%c0_46, %136, %c0_47], %139 {strides = array<i32>} : memref<1x32x32xbf16, #tpu.memory_space<vmem>>, vector<1x8x32xbf16>,
    %c3_i32_48 = arith.constant 3 : i32
    %c2_i32_49 = arith.constant 2 : i32
    %140 = arith.muli %c2_i32_49, %c3_i32_48 : i32
    %c3_i32_50 = arith.constant 3 : i32
    %141 = arith.subi %c3_i32_50, %140 : i32
    %142 = arith.muli %arg0, %141 : i32
    %143 = arith.addi %c3_i32_48, %142 : i32
    %c8_i32_51 = arith.constant 8 : i32
    %144 = arith.muli %143, %c8_i32_51 : i32
    %145 = tpu.assume_multiple %144, 8 : i32
    %146 = arith.index_cast %145 : i32 to index
    %c0_52 = arith.constant 0 : index
    %147 = vector.load %arg9[%146, %c0_52] : memref<32x128xf32, #tpu.memory_space<vmem>>, vector<8x128xf32>
    %148 = arith.truncf %134 : vector<8x32xf32> to vector<8x32xbf16>
    %cst_53 = arith.constant dense<0.000000e+00> : vector<8x128xf32>
    %149 = tpu.matmul %148, %14, %cst_53 {dimension_numbers = #tpu.dot_dimension_numbers<[1], [0], [0], [1], [0, 0, 1, 1], [], []>} : vector<8x32xbf16>, vector<32x128xbf16>, vector<8x128xf32> -> vector<8x128xf32>
    %150 = arith.addf %147, %149 : vector<8x128xf32>
    %151 = vector.extract_strided_slice %150 {offsets = [0, 0], sizes = [8, 32], strides = [1, 1]} : vector<8x128xf32> to vector<8x32xf32>
    %152 = arith.negf %151 : vector<8x32xf32>
    %153 = math.exp %152 : vector<8x32xf32>
    %cst_54 = arith.constant 1.000000e+00 : f32
    %154 = vector.broadcast %cst_54 : f32 to vector<8x32xf32>
    %155 = arith.addf %154, %153 : vector<8x32xf32>
    %156 = arith.divf %154, %155 : vector<8x32xf32>
    %157 = vector.extract_strided_slice %150 {offsets = [0, 32], sizes = [8, 32], strides = [1, 1]} : vector<8x128xf32> to vector<8x32xf32>
    %158 = arith.negf %157 : vector<8x32xf32>
    %159 = math.exp %158 : vector<8x32xf32>
    %cst_55 = arith.constant 1.000000e+00 : f32
    %160 = vector.broadcast %cst_55 : f32 to vector<8x32xf32>
    %161 = arith.addf %160, %159 : vector<8x32xf32>
    %162 = arith.divf %160, %161 : vector<8x32xf32>
    %163 = vector.extract_strided_slice %150 {offsets = [0, 64], sizes = [8, 32], strides = [1, 1]} : vector<8x128xf32> to vector<8x32xf32>
    %164 = math.tanh %163 : vector<8x32xf32>
    %165 = vector.extract_strided_slice %150 {offsets = [0, 96], sizes = [8, 32], strides = [1, 1]} : vector<8x128xf32> to vector<8x32xf32>
    %166 = arith.negf %165 : vector<8x32xf32>
    %167 = math.exp %166 : vector<8x32xf32>
    %cst_56 = arith.constant 1.000000e+00 : f32
    %168 = vector.broadcast %cst_56 : f32 to vector<8x32xf32>
    %169 = arith.addf %168, %167 : vector<8x32xf32>
    %170 = arith.divf %168, %169 : vector<8x32xf32>
    %171 = arith.mulf %162, %132 : vector<8x32xf32>
    %172 = arith.mulf %156, %164 : vector<8x32xf32>
    %173 = arith.addf %171, %172 : vector<8x32xf32>
    %174 = math.tanh %173 : vector<8x32xf32>
    %175 = arith.mulf %170, %174 : vector<8x32xf32>
    %176 = arith.truncf %175 : vector<8x32xf32> to vector<8x32xbf16>
    %c0_57 = arith.constant 0 : index
    %177 = arith.index_cast %145 : i32 to index
    %c0_58 = arith.constant 0 : index
    %178 = vector.load %arg6[%c0_57, %177, %c0_58] : memref<1x32x32xbf16, #tpu.memory_space<vmem>>, vector<1x8x32xbf16>
    %179 = vector.shape_cast %178 : vector<1x8x32xbf16> to vector<8x32xbf16>
    %180 = vector.shape_cast %176 : vector<8x32xbf16> to vector<1x8x32xbf16>
    tpu.vector_store %arg6[%c0_57, %177, %c0_58], %180 {strides = array<i32>} : memref<1x32x32xbf16, #tpu.memory_space<vmem>>, vector<1x8x32xbf16>,
    %c4_i32 = arith.constant 4 : i32
    %c0_59 = arith.constant 0 : index
    %c0_60 = arith.constant 0 : index
    %181 = vector.load %arg7[%c0_59, %c0_60] : memref<8x32xf32, #tpu.memory_space<vmem>>, vector<8x32xf32>
    tpu.vector_store %arg7[%c0_59, %c0_60], %175 {strides = array<i32>} : memref<8x32xf32, #tpu.memory_space<vmem>>, vector<8x32xf32>,
    %c0_61 = arith.constant 0 : index
    %c0_62 = arith.constant 0 : index
    %182 = vector.load %arg8[%c0_61, %c0_62] : memref<8x32xf32, #tpu.memory_space<vmem>>, vector<8x32xf32>
    tpu.vector_store %arg8[%c0_61, %c0_62], %173 {strides = array<i32>} : memref<8x32xf32, #tpu.memory_space<vmem>>, vector<8x32xf32>,
    return
  }
  func.func @transform_0(%arg0: i32, %arg1: i32) -> (i32, i32, i32) {
    %c1_i32 = arith.constant 1 : i32
    %0 = arith.muli %arg0, %c1_i32 : i32
    %c2_i32 = arith.constant 2 : i32
    %1 = arith.muli %c2_i32, %arg0 : i32
    %c1_i32_0 = arith.constant 1 : i32
    %2 = arith.subi %c1_i32_0, %1 : i32
    %3 = arith.muli %2, %arg1 : i32
    %4 = arith.addi %0, %3 : i32
    %c0_i32 = arith.constant 0 : i32
    %c0_i32_1 = arith.constant 0 : i32
    %c0_i32_2 = arith.constant 0 : i32
    return %c0_i32, %4, %c0_i32_1 : i32, i32, i32
  }
  func.func @transform_1(%arg0: i32, %arg1: i32) -> (i32, i32, i32, i32) {
    %c0_i32 = arith.constant 0 : i32
    %c0_i32_0 = arith.constant 0 : i32
    %c0_i32_1 = arith.constant 0 : i32
    %c0_i32_2 = arith.constant 0 : i32
    return %arg0, %c0_i32, %c0_i32_0, %c0_i32_1 : i32, i32, i32, i32
  }
  func.func @transform_2(%arg0: i32, %arg1: i32) -> (i32, i32, i32) {
    %c0_i32 = arith.constant 0 : i32
    %c0_i32_0 = arith.constant 0 : i32
    %c0_i32_1 = arith.constant 0 : i32
    return %arg0, %c0_i32, %c0_i32_0 : i32, i32, i32
  }
  func.func @transform_3(%arg0: i32, %arg1: i32) -> (i32, i32, i32) {
    %c0_i32 = arith.constant 0 : i32
    %c0_i32_0 = arith.constant 0 : i32
    %c0_i32_1 = arith.constant 0 : i32
    return %arg0, %c0_i32, %c0_i32_0 : i32, i32, i32
  }
  func.func @transform_4(%arg0: i32, %arg1: i32) -> (i32, i32, i32) {
    %c1_i32 = arith.constant 1 : i32
    %0 = arith.muli %arg0, %c1_i32 : i32
    %c2_i32 = arith.constant 2 : i32
    %1 = arith.muli %c2_i32, %arg0 : i32
    %c1_i32_0 = arith.constant 1 : i32
    %2 = arith.subi %c1_i32_0, %1 : i32
    %3 = arith.muli %2, %arg1 : i32
    %4 = arith.addi %0, %3 : i32
    %c0_i32 = arith.constant 0 : i32
    %c0_i32_1 = arith.constant 0 : i32
    return %arg0, %4, %c0_i32 : i32, i32, i32
  }
}

</mosaic_0001>

<bundles_post_ra>
// kernel: tpu_custom_call.1
= control target key start
LH: loop header
LB: loop body
LE: loop exit
PB: predicated region body
PF: predicated region fallthrough
CT: control target
= control target key end

     0   :  { %s1627_s0 = inlined_call_operand.vmem [shape: bf16[1,64,32], index: 0, kind: input, shape index: {}]   ;;  %s1628_s1 = inlined_call_operand.vmem [shape: bf16[2,1,32,128], index: 1, kind: input, shape index: {}]   ;;  %s1629_s2 = inlined_call_operand.hbm [shape: bf16[2,32,128], index: 2, kind: input, shape index: {}]   ;;  %s1630_s3 = inlined_call_operand.vmem [shape: f32[2,1,128], index: 3, kind: input, shape index: {}]   ;;  %s1631_s4 = inlined_call_operand.vmem [shape: bf16[2,64,32], index: 4, kind: output, shape index: {}]  }
   0x1   :  { %1634 = sst [smem:[#allocation11_spill]] %s1629_s2 }
   0x2   :  { %9 = vsyncpa [#allocation6], 0 }
   0x3   :  { %11 = vsyncpa [#allocation6 + $0x1], 0  ;;  %s1358_s15 = smov 0   ;;  %s1360_s16 = smov 0  }
   0x4   :  { %s1362_s17 = smov 0   ;;  %s1364_s18 = smov 0  }
   0x5   :  { %s1366_s19 = smov 0   ;;  %s1368_s20 = smov 0  }
   0x6   :  { %s1370_s21 = smov 0   ;;  %s1372_s22 = smov 0  }
   0x7 LB: > { %1635 = sst [smem:[#allocation8_spill]] %s1318_s21  ;;  %s985_s23 = sadd.s32 4294967295, %s1322_s22   ;;  %s1322_s22 = sphi %s1372_s22, %s17_s22   ;;  %s1318_s21 = sphi %s1370_s21, %s1646_s21   ;;  %s1314_s20 = sphi %s1368_s20, %s1651_s20   ;;  %s1310_s19 = sphi %s1366_s19, %s1644_s19   ;;  %s1306_s18 = sphi %s1364_s18, %s1650_s18   ;;  %s1302_s17 = sphi %s1362_s17, %s1649_s17   ;;  %s1298_s16 = sphi %s1360_s16, %s1648_s16   ;;  %s1294_s15 = sphi %s1358_s15, %s1647_s15  }
   0x8   : > { %s26_s24 = sadd.s32 1, %s1314_s20  ;;  %s29_s25 = sadd.s32 1, %s1318_s21 }
   0x9   : > { %p27_p0 = scmp.ge.s32.totalorder %s26_s24, 2  ;;  %s96_s26 = sadd.s32 1, %s1302_s17 }
   0xa   : > { %p103_p1 = scmp.ne.s32.totalorder %s1302_s17, %s1298_s16  ;;  %p104_p2 = scmp.eq.s32.totalorder %s1322_s22, 0 }
   0xb   : > { %s1653_s24 = smov (%p27_p0, %s26_s24), 0  ;;  %s1655_s25 = smov (!%p27_p0, %s29_s25), %s1318_s21 }
   0xc   : > { %1636 = sst [smem:[#allocation9_spill]] %s1653_s24  ;;  %p109_p3 = scmp.ne.s32.totalorder %s1298_s16, %s1294_s15 }
   0xd   : > { %p31_p4 = scmp.ge.s32.totalorder %s1655_s25, 2  ;;  %p110_p5 = scmp.eq.s32.totalorder %s985_s23, 0 }
   0xe   : > { %p1407_p6 = por %p104_p2, %p103_p1  ;;  %p1115_p8 = scmp.lt.s32.totalorder %s1322_s22, 4 }
   0xf   : > { %s1657_s25 = smov (%p31_p4, %s1655_s25), 0  ;;  %p1413_p7 = por %p110_p5, %p109_p3 }
  0x10   : > { %1638 = sst [smem:[#allocation10_spill]] %s1657_s25  ;;  %s93_s29 = ssub.s32 %s1318_s21, %s1657_s25 }
  0x11   : > { %s220_s30 = sand.u32 1, %s1302_s17   ;;  %p94_p9 = scmp.eq.s32.totalorder %s93_s29, 0 }
  0x12   : > { %s993_s5 = sshll.u32 %s220_s30, 4  ;;  %s1042_s6 = sshll.u32 %s1318_s21, 8 }
  0x13   : > { %s1423_s7 = scalar_select %p94_p9, %s1302_s17, %s96_s26  }
  0x14   : > { %s1640_s2 = sld [smem:[#allocation11_spill]]  ;;  %s224_s11 = scalar_lea.vmem [#allocation5], %s993_s5 }
  0x15   : > { %s231_s12 = sshll.u32 %s224_s11, 4  ;;  %p1432_p10 = pnand %p1115_p8, %p1407_p6  ;;  %s1436_s12 = int_to_ptr.vmem [resolvable:$true] %s231_s12 }
  0x16   : > { %s1438_s14 = scalar_lea.sflag [#allocation6], %s220_s30 }
  0x17   : > { %p1228_p12 = pneg %p1432_p10 }
  0x1a   : > { %s1428_s10 = scalar_lea.hbm %s1640_s2, %s1042_s6  ;;  %s1231_s27 = scalar_lea.hbm %s1640_s2, 512 }
  0x1b   : > { %s1226_s15 = scalar_lea.hbm %s1428_s10, 256  ;;  %p1232_p1 = scmp.lt.u32.totalorder %s1428_s10, %s1640_s2 }
  0x1c   : > { %p1227_p11 = scmp.ne.s32.totalorder %s1428_s10, %s1226_s15  ;;  %p1233_p2 = scmp.lt.u32.totalorder %s1231_s27, %s1226_s15 }
  0x1d   : > { %p1235_p4 = scmp.lt.u32.totalorder %s1226_s15, %s1428_s10 }
  0x1e   : > { %p1229_p13 = pnand %p1228_p12, %p1227_p11  ;;  %p1234_p3 = por %p1233_p2, %p1232_p1 }
  0x20   : > { %p1230_p0 = pneg %p1229_p13  ;;  %p1236_p5 = por %p1235_p4, %p1234_p3 }
  0x22   : > { %p1237_p6 = pnand %p1236_p5, %p1230_p0 }
  0x24   : > { %1240 = shalt.err (!%p1237_p6)
}
  0x25   : > { %s1241_s30 = scalar_lea.vmem %s1436_s12, 256  ;;  %s1324_s6 = smov [#allocation5]  }
  0x26   : > { %p1242_p8 = scmp.ne.s32.totalorder %s1436_s12, %s1241_s30  ;;  %s1246_s8 = sshll.u32 %s1324_s6, 4  ;;  %s1247_s8 = int_to_ptr.vmem [resolvable:$false] %s1246_s8 }
  0x27   : > { %s1248_s9 = scalar_lea.vmem %s1247_s8, 512  ;;  %p1249_p13 = scmp.lt.s32.totalorder %s1436_s12, %s1247_s8 }
  0x28   : > { %p1244_p9 = pnand %p1242_p8, %p1228_p12  ;;  %p1250_p1 = scmp.lt.s32.totalorder %s1248_s9, %s1241_s30 }
  0x2a   : > { %p1245_p11 = pneg %p1244_p9  ;;  %p1251_p2 = por %p1250_p1, %p1249_p13 }
  0x2c   : > { %p1252_p3 = pnand %p1251_p2, %p1245_p11 }
  0x2e   : > { %1255 = shalt.err (!%p1252_p3)
}
  0x2f   : > { %s1325_s11 = smov 64   ;;  %s1326_s15 = smov 4  }
  0x30   : > { %1114 = dma.hbm_to_vmem [thread:$0]  (!%p1432_p10), %s1428_s10, 256, %s1436_s12, %s1438_s14, %s1325_s11, %s1325_s11, %s1326_s15  }
  0x31   : > { %p996_p12 = scmp.ge.s32.totalorder %s1322_s22, 1  ;;  %p245_p0 = scmp.lt.s32.totalorder %s1322_s22, 5 }
  0x33   : > { %p246_p4 = pnand %p996_p12, %p245_p0 }
  0x34   : > { %s251_s23 = sand.u32 (!%p246_p4), 1, %s1298_s16  }
  0x35   : > { %249 = sbr.rel (%p246_p4) target bundleno = 2919 (0xb67), region = 36  ;;  %s1469_s26 = sshll.u32 (!%p246_p4), %s251_s23, 4 }
  0x36   : > { %s252_s27 = scalar_lea.sflag (!%p246_p4), [#allocation6], %s251_s23 }
  0x3c   : > { %1289 = dma.done.wait (%p1413_p7), %s252_s27, 256  }
  0x3d   : > { %1291 = vsyncadd (%p1413_p7), %s252_s27, 4294967040  ;;  %s998_s10 = sshll.u32 %s1310_s19, 1  ;;  %p319_p10 = scmp.lt.s32.totalorder %s1310_s19, 1 }
  0x3e   : > { %s306_s12 = ssub.s32 1, %s998_s10  ;;  %p1007_p7 = scmp.ne.s32.totalorder %s1306_s18, 0 }
  0x3f   : > { %s307_s13 = smul.u32 %s1306_s18, %s306_s12  ;;  %vm350_vm0 = vcmask (!%p1007_p7), 261120   ;;  %v1327_v0 = vmov (!%p1007_p7), 0.0  }
  0x40   : > { %s1480_s14 = scalar_select %p319_p10, %s1310_s19, 1 }
  0x41   : > { %s308_s5 = sadd.s32 %s1310_s19, %s307_s13  ;;  %351 = vst.msk [vmem:[#allocation2] sm:$0xff] (!%p1007_p7), %vm350_vm0, %v1327_v0  ;;  %352 = vst.msk [vmem:[#allocation3] sm:$0xff] (!%p1007_p7), %vm350_vm0, %v1327_v0 }
  0x42   : > { %s999_s30 = sshll.u32 %s308_s5, 2  ;;  %s1043_s6 = sshll.u32 %s1480_s14, 4 }
  0x43   : > { %p310_p5 = scmp.lt.s32.totalorder %s999_s30, 7  ;;  %s323_s9 = scalar_lea.vmem %s1628_s1, %s1043_s6 }
  0x44   : > { %s326_s23 = scalar_lea.vmem %s1630_s3, %s1480_s14  ;;  %s1005_s27 = sshll.u32 %s1480_s14, 3 }
  0x45   : > { %s1659_s30 = smov (!%p310_p5, %s999_s30), 7  ;;  %349 = sbr.rel (%p1007_p7) target bundleno = 76 (0x4c), region = 44 }
  0x46   : > { %s1000_s10 = sshll.u32 %s1659_s30, 2  ;;  %s337_s12 = sadd.s32 %s1005_s27, %s1659_s30 }
  0x47   : > { %s313_s25 = scalar_lea.vmem %s1627_s0, %s1000_s10  ;;  %s1006_s13 = sshll.u32 %s337_s12, 2 }
  0x48   : > { %s1498_s21 = scalar_lea.vmem %s1631_s4, %s1006_s13 }
  0x4c PF: > { %v1188_v1 = vld [vmem:[%s323_s9] sm:$0xff]   ;;  %vm390_vm1 = vcmask 261120   ;;  %v1189_v2 = vld [vmem:[%s323_s9 + $0x8] sm:$0xff]   ;;  %v1328_v4 = vmov 0.0   ;;  %vm1329_vm2 = vmmov 0   ;;  %s1642_s2 = scalar_lea.vmem [#allocation5], %s1469_s26 }
  0x4d   : > { %1069 = vmatprep.subr.bf16.mxu0 %v1188_v1  ;;  %v1190_v3 = vld [vmem:[%s313_s25] sm:$0xff]   ;;  %1077 = vmatprep.subr.bf16.mxu1 %v1328_v4  ;;  %v1191_v6 = vld [vmem:[%s313_s25 + $0x8] sm:$0xff]   ;;  %s1643_s18 = smov %s1642_s2  ;;  %s456_s26 = smul.u32 24, %s1310_s19  ;;  %vm555_vm3 = vcmask 257024  }
  0x4e   : > { %1070 = vmatpush3.bf16.msra.mxu0 %v1188_v1  ;;  %1081 = vmatprep.mubr.msk.bf16.mxu1 %vm1329_vm2, %v1328_v4  ;;  %v1507_v5 = vld [vmem:[%s1642_s2] sm:$0xff]   ;;  %v1512_v7 = vld [vmem:[%s1643_s18 + $0x8] sm:$0xff]   ;;  %s1330_s14 = smov 64   ;;  %s1331_s30 = smov 32  }
  0x4f   : > { %1071 = vmatprep.subr.bf16.mxu0 %v1189_v2  ;;  %1073 = vmatprep.mubr.msk.bf16.mxu0 %vm390_vm1, %v1190_v3  ;;  %v454_v8 = vld [vmem:[#allocation2] sm:$0xff]  ;;  %s457_s29 = scalar_lea.vmem [#allocation4], %s456_s26  ;;  %v455_v26 = vld [vmem:[#allocation3] sm:$0xff]  ;;  %s1045_s6 = sshll.u32 %s1310_s19, 3 }
  0x50   : > { %1078 = vmatpush3.bf16.msra.mxu1 %v1507_v5  ;;  %v459_v9 = vpack.c.bf16 %v454_v8, %v454_v8  ;;  %v1008_v10 = vld [vmem:[%s326_s23] ss:$0 sm:$0xff]  ;;  %s910_s28 = scalar_lea.vmem [#allocation4], %s1045_s6  ;;  %s643_s8 = ssub.s32 2, %s1310_s19 }
  0x51   : > { %1079 = vmatprep.subr.bf16.mxu1 %v1328_v4  ;;  %s1565_s9 = sshll.u32 %s643_s8, 3  ;;  %s1052_s15 = smul.u32 4294967272, %s1310_s19 }
  0x52   : > { %1072 = vmatpush3.bf16.msra.mxu0 %v1189_v2  ;;  %s645_s11 = scalar_lea.vmem [#allocation4], %s1565_s9  ;;  %s551_s27 = sshra.s32 %s456_s26, 3 }
  0x53   : > { %1085 = vmatprep.subr.bf16.mxu0 %v1328_v4  ;;  %s920_s23 = scalar_lea.vmem [#allocation4], %s1052_s15  ;;  %s1020_s10 = sshll.u32 %s551_s27, 2 }
  0x54   : > { %1080 = vmatpush3.bf16.msra.mxu1 %v1512_v7  ;;  %s554_s12 = scalar_lea.vmem %s1498_s21, %s1020_s10  ;;  %s1046_s13 = sadd.s32 8, %s1045_s6 }
  0x55   : > { %1074 = vmatmul.mubr.msk.bf16.vlgmr.msra.gmra.mrb[0].mxu0 %vm390_vm1, %v1191_v6  ;;  %1093 = vmatprep.subr.bf16.mxu1 %v1328_v4  ;;  %s638_s5 = sshra.s32 %s1046_s13, 3  ;;  %s724_s2 = sshra.s32 %s1565_s9, 3 }
  0x56   : > { %1086 = vmatpush3.bf16.msra.mxu0 %v1507_v5  ;;  %1089 = vmatprep.mubr.msk.bf16.mxu0 %vm1329_vm2, %v1328_v4  ;;  %s1027_s18 = sshll.u32 %s638_s5, 2  ;;  %s1032_s24 = sshll.u32 %s724_s2, 2 }
  0x57   : > { %1087 = vmatprep.subr.bf16.mxu0 %v1328_v4  ;;  %1082 = vmatmul.mubr.msk.bf16.vlgmr.msra.gmra.mrb[0].mxu1 %vm390_vm1, %v459_v9  ;;  %s641_s25 = scalar_lea.vmem %s1498_s21, %s1027_s18  ;;  %s727_s26 = scalar_lea.vmem %s1498_s21, %s1032_s24 }
  0x58   : > { %1094 = vmatpush3.bf16.msra.mxu1 %v1507_v5  ;;  %1097 = vmatprep.mubr.msk.bf16.mxu1 %vm1329_vm2, %v1328_v4 }
  0x59   : > { %1095 = vmatprep.subr.bf16.mxu1 %v1328_v4 }
  0x5a   : > { %1088 = vmatpush3.bf16.msra.mxu0 %v1512_v7 }
  0x5b   : > { %1101 = vmatprep.subr.bf16.mxu0 %v1328_v4 }
  0x5c   : > { %1096 = vmatpush3.bf16.msra.mxu1 %v1512_v7 }
 0x128   : > { %v1075_v11 = vpop.f32.mrb[0].mxu0 }
 0x129   : > { %v440_v12 = vadd.f32 %v1075_v11, %v1008_v10  ;;  %v431_v13 = vpop.f32.mrb[1].mxu0 }
 0x12a   : > { %v432_v14 = vadd.f32 %v1008_v10, %v431_v13  ;;  %v1076_v15 = vpop.f32.mrb[2].mxu0  ;;  %v509_v18 = vpop.f32.mrb[0].mxu1 }
 0x12b   : > { %448 = vst [vmem:[#allocation4 + $0x10] sm:$0xff] %v440_v12  ;;  %v443_v16 = vadd.f32 %v1076_v15, %v1008_v10  ;;  %v434_v17 = vpop.f32.mrb[3].mxu0  ;;  %v1083_v20 = vpop.f32.mrb[1].mxu1 }
 0x12c   : > { %446 = vst [vmem:[#allocation4] sm:$0xff] %v432_v14  ;;  %v435_v19 = vadd.f32 %v1008_v10, %v434_v17  ;;  %v512_v21 = vpop.f32.mrb[2].mxu1 }
 0x12d   : > { %449 = vst [vmem:[#allocation4 + $0x18] sm:$0xff] %v443_v16  ;;  %v1084_v22 = vpop.f32.mrb[3].mxu1 }
 0x12e   : > { %447 = vst [vmem:[#allocation4 + $0x8] sm:$0xff] %v435_v19 }
 0x135   : > { %v458_v23 = vld [vmem:[%s457_s29] sm:$0xff]  ;;  %v1023_v42 = vld [vmem:[%s910_s28 + $0x8] sm:$0xff]  ;;  %v1035_v20 = vld [vmem:[%s920_s23 + $0x18] sm:$0xff]  ;;  %s1332_s29 = smov 96  }
 0x136   : > { %v515_v24 = vadd.f32 %v509_v18, %v458_v23  ;;  %v646_v63 = vld [vmem:[%s645_s11] sm:$0xff] }
 0x138   : > { %1194 = vtanh.f32 %v515_v24  ;;  %v1018_v27 = vmul.f32 -1.442695, %v515_v24 }
 0x13a   : > { %1196 = vpow2.f32 %v1018_v27 }
 0x142   : > { %v1195_v25 = vpop.eup %1194 }
 0x143   : > { %529 = vrot.lane.b32.xlu0 %v1195_v25, %s1330_s14 }
 0x144   : > { %v1197_v28 = vpop.eup %1196 }
 0x145   : > { %v519_v29 = vadd.f32 1.0, %v1197_v28 }
 0x147   : > { %524 = vrot.lane.b32.xlu0 %v455_v26, %s1331_s30  ;;  %1198 = vrcp.f32 %v519_v29 }
 0x151   : > { %v1199_v30 = vpop.eup %1198 }
 0x1b5   : > { %v530_v31 = vpop.permute.xlu0 %529 }
 0x1b6   : > { %v532_v32 = vmul.f32 %v1199_v30, %v530_v31 }
 0x1b8   : > { %534 = vrot.lane.b32.xlu1 %v532_v32, %s1331_s30 }
 0x1b9   : > { %v525_v33 = vpop.permute.xlu0 %524 }
 0x1ba   : > { %v527_v34 = vmul.f32 %v1199_v30, %v525_v33 }
 0x22a   : > { %v535_v35 = vpop.permute.xlu1 %534 }
 0x22b   : > { %v537_v36 = vadd.f32 %v535_v35, %v527_v34 }
 0x22d   : > { %1200 = vtanh.f32 %v537_v36 }
 0x237   : > { %v1201_v37 = vpop.eup %1200 }
 0x238   : > { %540 = vrot.lane.b32.xlu1 %v1201_v37, %s1330_s14 }
 0x2aa   : > { %v541_v38 = vpop.permute.xlu1 %540 }
 0x2ab   : > { %v543_v39 = vmul.f32 %v1199_v30, %v541_v38 }
 0x2ad   : > { %v1543_v40 = vpack.c.bf16 %v543_v39, %v543_v39 }
 0x2af   : > { %561 = vrot.lane.b32.xlu0 %v1543_v40, %s1331_s30 }
 0x321   : > { %v562_v41 = vpop.permute.xlu0 %561 }
 0x322   : > { %1090 = vmatmul.mubr.msk.bf16.vlgmr.msra.gmra.mrb[4].mxu0 %vm390_vm1, %v562_v41 }
 0x323   : > { %1102 = vmatpush3.bf16.msra.mxu0 %v1507_v5  ;;  %1105 = vmatprep.mubr.msk.bf16.mxu0 %vm1329_vm2, %v1328_v4 }
 0x324   : > { %1103 = vmatprep.subr.bf16.mxu0 %v1328_v4 }
 0x327   : > { %1104 = vmatpush3.bf16.msra.mxu0 %v1512_v7 }
 0x3f5   : > { %v600_v43 = vpop.f32.mrb[4].mxu0 }
 0x3f6   : > { %v606_v44 = vadd.f32 %v1023_v42, %v600_v43  ;;  %v1091_v45 = vpop.f32.mrb[5].mxu0 }
 0x3f7   : > { %v603_v46 = vpop.f32.mrb[6].mxu0 }
 0x3f8   : > { %1202 = vtanh.f32 %v606_v44  ;;  %v1092_v47 = vpop.f32.mrb[7].mxu0  ;;  %v1025_v49 = vmul.f32 -1.442695, %v606_v44 }
 0x3fa   : > { %1204 = vpow2.f32 %v1025_v49 }
 0x402   : > { %v1203_v48 = vpop.eup %1202 }
 0x403   : > { %616 = vrot.lane.b32.xlu1 %v1203_v48, %s1330_s14 }
 0x404   : > { %v1205_v50 = vpop.eup %1204 }
 0x405   : > { %v610_v51 = vadd.f32 1.0, %v1205_v50 }
 0x407   : > { %1206 = vrcp.f32 %v610_v51 }
 0x411   : > { %v1207_v52 = vpop.eup %1206 }
 0x412   : > { %v614_v55 = vmul.f32 %v1207_v52, %v537_v36 }
 0x475   : > { %v617_v53 = vpop.permute.xlu1 %616 }
 0x476   : > { %v619_v54 = vmul.f32 %v1207_v52, %v617_v53 }
 0x478   : > { %621 = vrot.lane.b32.xlu0 %v619_v54, %s1331_s30 }
 0x4ea   : > { %v622_v56 = vpop.permute.xlu0 %621 }
 0x4eb   : > { %v624_v57 = vadd.f32 %v622_v56, %v614_v55 }
 0x4ed   : > { %1208 = vtanh.f32 %v624_v57 }
 0x4f7   : > { %v1209_v58 = vpop.eup %1208 }
 0x4f8   : > { %627 = vrot.lane.b32.xlu1 %v1209_v58, %s1330_s14 }
 0x56a   : > { %v628_v59 = vpop.permute.xlu1 %627 }
 0x56b   : > { %v630_v60 = vmul.f32 %v1207_v52, %v628_v59 }
 0x56d   : > { %v1559_v61 = vpack.c.bf16 %v630_v60, %v630_v60 }
 0x56f   : > { %647 = vrot.lane.b32.xlu0 %v1559_v61, %s1331_s30 }
 0x5e1   : > { %v648_v62 = vpop.permute.xlu0 %647 }
 0x5e2   : > { %1098 = vmatmul.mubr.msk.bf16.vlgmr.msra.gmra.mrb[4].mxu1 %vm390_vm1, %v648_v62 }
 0x6b5   : > { %v686_v0 = vpop.f32.mrb[4].mxu1 }
 0x6b6   : > { %v692_v1 = vadd.f32 %v686_v0, %v646_v63  ;;  %v1099_v2 = vpop.f32.mrb[5].mxu1 }
 0x6b7   : > { %v689_v3 = vpop.f32.mrb[6].mxu1 }
 0x6b8   : > { %1210 = vtanh.f32 %v692_v1  ;;  %v1100_v4 = vpop.f32.mrb[7].mxu1  ;;  %v1030_v6 = vmul.f32 -1.442695, %v692_v1 }
 0x6ba   : > { %1212 = vpow2.f32 %v1030_v6 }
 0x6c2   : > { %v1211_v5 = vpop.eup %1210 }
 0x6c3   : > { %702 = vrot.lane.b32.xlu1 %v1211_v5, %s1330_s14 }
 0x6c4   : > { %v1213_v7 = vpop.eup %1212 }
 0x6c5   : > { %v696_v8 = vadd.f32 1.0, %v1213_v7 }
 0x6c7   : > { %1214 = vrcp.f32 %v696_v8 }
 0x6d1   : > { %v1215_v9 = vpop.eup %1214 }
 0x6d2   : > { %v700_v12 = vmul.f32 %v1215_v9, %v624_v57 }
 0x735   : > { %v703_v10 = vpop.permute.xlu1 %702 }
 0x736   : > { %v705_v11 = vmul.f32 %v1215_v9, %v703_v10 }
 0x738   : > { %707 = vrot.lane.b32.xlu0 %v705_v11, %s1331_s30 }
 0x7aa   : > { %v708_v13 = vpop.permute.xlu0 %707 }
 0x7ab   : > { %v710_v14 = vadd.f32 %v708_v13, %v700_v12 }
 0x7ad   : > { %1216 = vtanh.f32 %v710_v14 }
 0x7b7   : > { %v1217_v15 = vpop.eup %1216 }
 0x7b8   : > { %713 = vrot.lane.b32.xlu1 %v1217_v15, %s1330_s14 }
 0x82a   : > { %v714_v16 = vpop.permute.xlu1 %713 }
 0x82b   : > { %v716_v17 = vmul.f32 %v1215_v9, %v714_v16 }
 0x82d   : > { %v717_v18 = vpack.c.bf16 %v716_v17, %v716_v17 }
 0x82f   : > { %734 = vrot.lane.b32.xlu0 %v717_v18, %s1331_s30 }
 0x8a1   : > { %v735_v19 = vpop.permute.xlu0 %734 }
 0x8a2   : > { %1106 = vmatmul.mubr.msk.bf16.vlgmr.msra.gmra.mrb[8].mxu0 %vm390_vm1, %v735_v19 }
 0x975   : > { %v773_v21 = vpop.f32.mrb[8].mxu0 }
 0x976   : > { %v779_v22 = vadd.f32 %v1035_v20, %v773_v21  ;;  %v1107_v23 = vpop.f32.mrb[9].mxu0 }
 0x977   : > { %v776_v24 = vpop.f32.mrb[10].mxu0 }
 0x978   : > { %1218 = vtanh.f32 %v779_v22  ;;  %v1108_v25 = vpop.f32.mrb[11].mxu0  ;;  %v1037_v27 = vmul.f32 -1.442695, %v779_v22 }
 0x97a   : > { %1220 = vpow2.f32 %v1037_v27 }
 0x982   : > { %v1219_v26 = vpop.eup %1218 }
 0x983   : > { %789 = vrot.lane.b32.xlu1 %v1219_v26, %s1330_s14 }
 0x984   : > { %v1221_v28 = vpop.eup %1220 }
 0x985   : > { %v783_v29 = vadd.f32 1.0, %v1221_v28 }
 0x987   : > { %1222 = vrcp.f32 %v783_v29 }
 0x991   : > { %v1223_v30 = vpop.eup %1222 }
 0x992   : > { %v787_v33 = vmul.f32 %v1223_v30, %v710_v14 }
 0x9f5   : > { %v790_v31 = vpop.permute.xlu1 %789 }
 0x9f6   : > { %v792_v32 = vmul.f32 %v1223_v30, %v790_v31 }
 0x9f8   : > { %794 = vrot.lane.b32.xlu0 %v792_v32, %s1331_s30 }
 0x9fc   : > { %548 = vrot.lane.b32.xlu0 %v1543_v40, %s1331_s30 }
 0xa00   : > { %721 = vrot.lane.b32.xlu0 %v717_v18, %s1331_s30 }
 0xa6a   : > { %v795_v34 = vpop.permute.xlu0 %794 }
 0xa6b   : > { %v797_v35 = vadd.f32 %v795_v34, %v787_v33 }
 0xa6d   : > { %1224 = vtanh.f32 %v797_v35 }
 0xa6e   : > { %v549_v36 = vpop.permute.xlu0 %548 }
 0xa6f   : > { %556 = vst.msk [vmem:[%s554_s12] sm:$0xf] %vm555_vm3, %v549_v36 }
 0xa72   : > { %v722_v42 = vpop.permute.xlu0 %721 }
 0xa77   : > { %v1225_v37 = vpop.eup %1224 }
 0xa78   : > { %800 = vrot.lane.b32.xlu1 %v1225_v37, %s1330_s14  ;;  %s1050_s14 = sadd.s32 24, %s1052_s15 }
 0xa79   : > { %s811_s6 = sshra.s32 %s1050_s14, 3 }
 0xa7a   : > { %s1039_s28 = sshll.u32 %s811_s6, 2 }
 0xa7b   : > { %s814_s8 = scalar_lea.vmem %s1498_s21, %s1039_s28 }
 0xa7c   : > { %635 = vrot.lane.b32.xlu1 %v1559_v61, %s1331_s30 }
 0xaea   : > { %v801_v38 = vpop.permute.xlu1 %800 }
 0xaeb   : > { %v803_v39 = vmul.f32 %v1223_v30, %v801_v38 }
 0xaed   : > { %v1051_v40 = vpack.c.bf16 %v803_v39, %v803_v39  ;;  %817 = vrot.lane.b32.xlu0 %v803_v39, %s1331_s30 }
 0xaee   : > { %v636_v41 = vpop.permute.xlu1 %635 }
 0xaef   : > { %642 = vst.msk [vmem:[%s641_s25] sm:$0xf] %vm555_vm3, %v636_v41  ;;  %808 = vrot.lane.b32.xlu1 %v1051_v40, %s1331_s30 }
 0xaf0   : > { %728 = vst.msk [vmem:[%s727_s26] sm:$0xf] %vm555_vm3, %v722_v42 }
 0xaf3   : > { %822 = vrot.lane.b32.xlu1 %v797_v35, %s1332_s29 }
 0xb5f   : > { %v818_v43 = vpop.permute.xlu0 %817 }
 0xb60   : > { %820 = vst.msk [vmem:[#allocation2] sm:$0xff] %vm390_vm1, %v818_v43 }
 0xb61   : > { %v809_v44 = vpop.permute.xlu1 %808 }
 0xb62   : > { %815 = vst.msk [vmem:[%s814_s8] sm:$0xf] %vm555_vm3, %v809_v44 }
 0xb65   : > { %v823_v45 = vpop.permute.xlu1 %822 }
 0xb66   : > { %825 = vst.msk [vmem:[#allocation3] sm:$0xff] %vm390_vm1, %v823_v45 }
 0xb67 PF: > { %s17_s22 = sadd.s32 1, %s1322_s22   ;;  %s1644_s19 = sld [smem:[#allocation8_spill]] }
 0xb68   : > { %p14_p6 = scmp.ge.s32.totalorder %s17_s22, 6   ;;  %s1645_s30 = sld [smem:[#allocation9_spill]] }
 0xb69   : > { %s1646_s21 = sld [smem:[#allocation10_spill]]  ;;  %s1647_s15 = smov %s1298_s16 }
 0xb6a   : > { %s1648_s16 = smov %s1302_s17  ;;  %s1649_s17 = smov %s1423_s7 }
 0xb6b   : > { %s1650_s18 = smov %s1314_s20  ;;  %16 = sbr.rel (!%p14_p6) target bundleno = 7 (0x7), region = 97 }
 0xb6e   : > { %s1651_s20 = smov %s1645_s30 }
 0xb72   :  { %868 = vsyncpa [#allocation6], 1 }
 0xb73   :  { %870 = vsyncpa [#allocation6 + $0x1], 1 }

</bundles_post_ra>
